<compile_context>
chip_gen: v7x
topology: tpu7x:2x2x1
jax: 0.10.0
libtpu: 0.0.40
codegen_flags: <defaults>
</compile_context>

<pallas_src>
import jax
import jax.numpy as jnp
from jax.experimental import pallas as pl
from jax.experimental.pallas import tpu as pltpu


def _body_small_kernel(x_ref, w_ref, b_ref, o_ref):
    # x_ref: (TB, 128), w_ref: (128, 128) [VMEM-resident], b_ref: (1, 128) f32,
    # o_ref: (TB, 128) f32.
    acc = jnp.dot(x_ref[...], w_ref[...], preferred_element_type=jnp.float32)
    acc = acc + b_ref[...]                                   # f32 bias add (VPU)
    o_ref[...] = jnp.maximum(acc, 0.0).astype(o_ref.dtype)   # fused ReLU, lane-dense store


def body_small_forward(x, weight, bias, *, block_b=1024, use_bf16=True):
    """relu(x @ weight + bias).

    x: [B, 128], weight: [128, 128] (pre-transposed vs. torch's [out, in]),
    bias: [128]. Returns f32 [B, 128].
    """
    B, K = x.shape
    Kw, C = weight.shape
    assert K == Kw and bias.shape == (C,)

    # Batch tile: (8,128)-aligned, capped by block_b; pad B so the grid divides.
    tb = min(block_b, max(8, ((B + 7) // 8) * 8))
    Bp = ((B + tb - 1) // tb) * tb
    x_p = jnp.pad(x, ((0, Bp - B), (0, 0))) if Bp != B else x

    in_dtype = jnp.bfloat16 if use_bf16 else x.dtype
    x_in = x_p.astype(in_dtype)
    w_in = weight.astype(in_dtype)
    b2d = bias.reshape(1, C).astype(jnp.float32)

    out = pl.pallas_call(
        _body_small_kernel,
        out_shape=jax.ShapeDtypeStruct((Bp, C), jnp.float32),
        grid_spec=pltpu.PrefetchScalarGridSpec(
            num_scalar_prefetch=0,
            grid=(Bp // tb,),
            in_specs=[
                pl.BlockSpec((tb, K), lambda i: (i, 0)),   # batch-tiled activations
                pl.BlockSpec((K, C), lambda i: (0, 0)),    # weight stays VMEM-resident
                pl.BlockSpec((1, C), lambda i: (0, 0)),    # bias stays VMEM-resident
            ],
            out_specs=pl.BlockSpec((tb, C), lambda i: (i, 0)),
        ),
        compiler_params=pltpu.CompilerParams(
            dimension_semantics=("parallel",),
        ),
    )(x_in, w_in, b2d)

    return out[:B] if Bp != B else out


if __name__ == "__main__":
    in_features = 128
    out_features = 128
    batch = 16

    key = jax.random.PRNGKey(0)
    kx, kw, kb = jax.random.split(key, 3)

    # Deterministic init (uniform, same scale as PyTorch's default Linear init).
    bound = 1.0 / (in_features ** 0.5)
    weight = jax.random.uniform(kw, (in_features, out_features), jnp.float32,
                                minval=-bound, maxval=bound)
    bias = jax.random.uniform(kb, (out_features,), jnp.float32,
                              minval=-bound, maxval=bound)
    x = jax.random.normal(kx, (batch, in_features), jnp.float32)

    out = jax.block_until_ready(body_small_forward(x, weight, bias))

    # Reference: same bf16-rounded inputs, f32 accumulation (matches MXU path).
    xr = x.astype(jnp.bfloat16).astype(jnp.float32)
    wr = weight.astype(jnp.bfloat16).astype(jnp.float32)
    ref = jnp.maximum(xr @ wr + bias, 0.0)

    assert out.shape == (batch, out_features)
    assert jnp.allclose(out, ref, atol=1e-3, rtol=1e-3), float(jnp.max(jnp.abs(out - ref)))

    print("KERNEL_OK")
</pallas_src>

<mosaic_0001>
module attributes {stable_mosaic.version = 11 : i64} {
  func.func @_body_small_kernel(%arg0: i32, %arg1: memref<16x128xbf16, #tpu.memory_space<vmem>>, %arg2: memref<128x128xbf16, #tpu.memory_space<vmem>>, %arg3: memref<1x128xf32, #tpu.memory_space<vmem>>, %arg4: memref<16x128xf32, #tpu.memory_space<vmem>>) attributes {dimension_semantics = [#tpu.dimension_semantics<parallel>], iteration_bounds = array<i64: 1>, scalar_prefetch = 0 : i64, scratch_operands = 0 : i64, tpu.core_type = #tpu.core_type<tc>, window_params = [{transform_indices = @transform_0, window_bounds = array<i64: 16, 128>}, {pipeline_mode = #tpu.pipeline_mode<synchronous>, transform_indices = @transform_1, window_bounds = array<i64: 128, 128>}, {pipeline_mode = #tpu.pipeline_mode<synchronous>, transform_indices = @transform_2, window_bounds = array<i64: 1, 128>}, {transform_indices = @transform_3, window_bounds = array<i64: 16, 128>}]} {
    %c0 = arith.constant 0 : index
    %c0_0 = arith.constant 0 : index
    %0 = vector.load %arg1[%c0, %c0_0] : memref<16x128xbf16, #tpu.memory_space<vmem>>, vector<16x128xbf16>
    %c0_1 = arith.constant 0 : index
    %c0_2 = arith.constant 0 : index
    %1 = vector.load %arg2[%c0_1, %c0_2] : memref<128x128xbf16, #tpu.memory_space<vmem>>, vector<128x128xbf16>
    %cst = arith.constant dense<0.000000e+00> : vector<16x128xf32>
    %2 = tpu.matmul %0, %1, %cst {dimension_numbers = #tpu.dot_dimension_numbers<[1], [0], [0], [1], [0, 0, 1, 1], [], []>} : vector<16x128xbf16>, vector<128x128xbf16>, vector<16x128xf32> -> vector<16x128xf32>
    %c0_3 = arith.constant 0 : index
    %c0_4 = arith.constant 0 : index
    %3 = vector.load %arg3[%c0_3, %c0_4] : memref<1x128xf32, #tpu.memory_space<vmem>>, vector<1x128xf32>
    %4 = vector.broadcast %3 : vector<1x128xf32> to vector<16x128xf32>
    %5 = arith.addf %2, %4 : vector<16x128xf32>
    %cst_5 = arith.constant 0.000000e+00 : f32
    %6 = vector.broadcast %cst_5 : f32 to vector<16x128xf32>
    %7 = arith.maximumf %5, %6 : vector<16x128xf32>
    %c0_6 = arith.constant 0 : index
    %c0_7 = arith.constant 0 : index
    %8 = vector.load %arg4[%c0_6, %c0_7] : memref<16x128xf32, #tpu.memory_space<vmem>>, vector<16x128xf32>
    tpu.vector_store %arg4[%c0_6, %c0_7], %7 {strides = array<i32>} : memref<16x128xf32, #tpu.memory_space<vmem>>, vector<16x128xf32>,
    return
  }
  func.func @transform_0(%arg0: i32) -> (i32, i32) {
    %c0_i32 = arith.constant 0 : i32
    %c0_i32_0 = arith.constant 0 : i32
    return %arg0, %c0_i32 : i32, i32
  }
  func.func @transform_1(%arg0: i32) -> (i32, i32) {
    %c0_i32 = arith.constant 0 : i32
    %c0_i32_0 = arith.constant 0 : i32
    %c0_i32_1 = arith.constant 0 : i32
    return %c0_i32, %c0_i32_0 : i32, i32
  }
  func.func @transform_2(%arg0: i32) -> (i32, i32) {
    %c0_i32 = arith.constant 0 : i32
    %c0_i32_0 = arith.constant 0 : i32
    %c0_i32_1 = arith.constant 0 : i32
    return %c0_i32, %c0_i32_0 : i32, i32
  }
  func.func @transform_3(%arg0: i32) -> (i32, i32) {
    %c0_i32 = arith.constant 0 : i32
    %c0_i32_0 = arith.constant 0 : i32
    return %arg0, %c0_i32 : i32, i32
  }
}

</mosaic_0001>

<bundles_post_ra>
// kernel: tpu_custom_call.1
= control target key start
LH: loop header
LB: loop body
LE: loop exit
PB: predicated region body
PF: predicated region fallthrough
CT: control target
= control target key end

     0   :  { %8 = vsyncpa [#allocation3], 0  ;;  %s383_s0 = inlined_call_operand.hbm [shape: bf16[16,128], index: 0, kind: input, shape index: {}]   ;;  %s384_s1 = inlined_call_operand.hbm [shape: bf16[128,128], index: 1, kind: input, shape index: {}]   ;;  %s385_s2 = inlined_call_operand.vmem [shape: f32[1,128], index: 2, kind: input, shape index: {}]   ;;  %s386_s3 = inlined_call_operand.hbm [shape: f32[16,128], index: 3, kind: output, shape index: {}]  }
   0x1   :  { %9 = vsyncpa [#allocation6], 0 }
   0x2   :  { %10 = vsyncpa [#allocation4], 0  ;;  %s315_s12 = smov [#allocation2]   ;;  %s243_s16 = scalar_lea.hbm %s383_s0, 128 }
   0x3   :  { %s16_s13 = sshll.u32 %s315_s12, 4  ;;  %p244_p0 = scmp.ne.s32.totalorder %s383_s0, %s243_s16  ;;  %s17_s13 = int_to_ptr.vmem [resolvable:$true] %s16_s13 }
   0x4   :  { %p247_p1 = scmp.lt.u32.totalorder %s243_s16, %s383_s0 }
   0x6   :  { %p249_p2 = pnand %p247_p1, %p244_p0 }
   0x8   :  { %252 = shalt.err (!%p249_p2)
}
   0x9   :  { %s253_s21 = scalar_lea.vmem %s17_s13, 128  ;;  %p258_p4 = scmp.lt.s32.totalorder %s17_s13, %s17_s13 }
   0xa   :  { %p254_p3 = scmp.ne.s32.totalorder %s17_s13, %s253_s21  ;;  %p259_p5 = scmp.lt.s32.totalorder %s253_s21, %s253_s21 }
   0xc   :  { %p260_p6 = por %p259_p5, %p258_p4 }
   0xe   :  { %p261_p7 = pnand %p260_p6, %p254_p3 }
  0x10   :  { %264 = shalt.err (!%p261_p7)
}
  0x11   :  { %s316_s22 = smov 64   ;;  %s317_s23 = smov 4  }
  0x12   :  { %22 = dma.hbm_to_vmem [thread:$0]  %s383_s0, 128, %s17_s13, [#allocation3], %s316_s22, %s316_s22, %s317_s23  }
  0x13   :  { %s318_s26 = smov [#allocation5]   ;;  %s265_s30 = scalar_lea.hbm %s384_s1, 1024 }
  0x14   :  { %s28_s27 = sshll.u32 %s318_s26, 4  ;;  %p266_p8 = scmp.ne.s32.totalorder %s384_s1, %s265_s30  ;;  %s29_s27 = int_to_ptr.vmem [resolvable:$true] %s28_s27 }
  0x15   :  { %p269_p9 = scmp.lt.u32.totalorder %s265_s30, %s384_s1 }
  0x17   :  { %p271_p10 = pnand %p269_p9, %p266_p8 }
  0x19   :  { %274 = shalt.err (!%p271_p10)
}
  0x1a   :  { %s275_s8 = scalar_lea.vmem %s29_s27, 1024  ;;  %p280_p12 = scmp.lt.s32.totalorder %s29_s27, %s29_s27 }
  0x1b   :  { %p276_p11 = scmp.ne.s32.totalorder %s29_s27, %s275_s8  ;;  %p281_p13 = scmp.lt.s32.totalorder %s275_s8, %s275_s8 }
  0x1d   :  { %p282_p0 = por %p281_p13, %p280_p12 }
  0x1f   :  { %p283_p1 = pnand %p282_p0, %p276_p11 }
  0x21   :  { %286 = shalt.err (!%p283_p1)
}
  0x22   :  { %34 = dma.hbm_to_vmem [thread:$0]  %s384_s1, 1024, %s29_s27, [#allocation6], %s316_s22, %s316_s22, %s317_s23  }
  0x23   :  { %309 = dma.done.wait [#allocation3], 128  }
  0x24   :  { %310 = vsyncadd [#allocation3], 4294967168 }
  0x25   :  { %311 = dma.done.wait [#allocation6], 1024  }
  0x26   :  { %312 = vsyncadd [#allocation6], 4294966272  ;;  %v319_v0 = vmov 0.0   ;;  %vm320_vm0 = vmmov 0   ;;  %v234_v1 = vld [vmem:[#allocation5] sm:$0xff]   ;;  %v235_v2 = vld [vmem:[#allocation5 + $0x8] sm:$0xff]  }
  0x27   :  { %205 = vmatprep.subr.bf16.mxu0 %v319_v0  ;;  %221 = vmatprep.mubr.msk.bf16.mxu0 %vm320_vm0, %v319_v0  ;;  %v236_v3 = vld [vmem:[#allocation5 + $0x10] sm:$0xff]   ;;  %v237_v4 = vld [vmem:[#allocation5 + $0x18] sm:$0xff]   ;;  %v238_v5 = vld [vmem:[#allocation5 + $0x20] sm:$0xff]   ;;  %s321_s11 = smov [#allocation7]  }
  0x28   :  { %206 = vmatpush3.bf16.msra.mxu0 %v234_v1  ;;  %v239_v6 = vld [vmem:[#allocation5 + $0x28] sm:$0xff]   ;;  %v240_v7 = vld [vmem:[#allocation5 + $0x30] sm:$0xff]   ;;  %v241_v8 = vld [vmem:[#allocation5 + $0x38] sm:$0xff]   ;;  %s173_s12 = sshll.u32 %s321_s11, 4  ;;  %s174_s12 = int_to_ptr.vmem [resolvable:$true] %s173_s12 }
  0x29   :  { %207 = vmatprep.subr.bf16.mxu0 %v319_v0  ;;  %v242_v9 = vld [vmem:[#allocation2] sm:$0xff]   ;;  %s287_s13 = scalar_lea.vmem %s174_s12, 256  ;;  %p292_p3 = scmp.lt.s32.totalorder %s174_s12, %s174_s12 }
  0x2a   :  { %v186_v10 = vld [vmem:[%s385_s2] ss:$0 sm:$0xff]  ;;  %p288_p2 = scmp.ne.s32.totalorder %s174_s12, %s287_s13  ;;  %p293_p4 = scmp.lt.s32.totalorder %s287_s13, %s287_s13 }
  0x2c   :  { %208 = vmatpush3.bf16.msra.mxu0 %v235_v2  ;;  %p294_p5 = por %p293_p4, %p292_p3 }
  0x2d   :  { %209 = vmatprep.subr.bf16.mxu0 %v319_v0 }
  0x2e   :  { %p295_p6 = pnand %p294_p5, %p288_p2 }
  0x30   :  { %210 = vmatpush3.bf16.msra.mxu0 %v236_v3 }
  0x31   :  { %211 = vmatprep.subr.bf16.mxu0 %v319_v0 }
  0x34   :  { %212 = vmatpush3.bf16.msra.mxu0 %v237_v4 }
  0x35   :  { %213 = vmatprep.subr.bf16.mxu0 %v319_v0 }
  0x38   :  { %214 = vmatpush3.bf16.msra.mxu0 %v238_v5 }
  0x39   :  { %215 = vmatprep.subr.bf16.mxu0 %v319_v0 }
  0x3c   :  { %216 = vmatpush3.bf16.msra.mxu0 %v239_v6 }
  0x3d   :  { %217 = vmatprep.subr.bf16.mxu0 %v319_v0 }
  0x40   :  { %218 = vmatpush3.bf16.msra.mxu0 %v240_v7 }
  0x41   :  { %219 = vmatprep.subr.bf16.mxu0 %v319_v0 }
  0x44   :  { %220 = vmatpush3.bf16.msra.mxu0 %v241_v8 }
  0x47   :  { %222 = vmatmul.mubr.bf16.vlgmr.msra.gmra.mrb[0].mxu0 %v242_v9 }
 0x11a   :  { %v157_v11 = vpop.f32.mrb[0].mxu0 }
 0x11b   :  { %v158_v12 = vadd.f32 %v186_v10, %v157_v11  ;;  %v223_v13 = vpop.f32.mrb[1].mxu0 }
 0x11c   :  { %v160_v14 = vpop.f32.mrb[2].mxu0 }
 0x11d   :  { %v164_v15 = vmax.f32 %v158_v12, 0.0  ;;  %v161_v16 = vadd.f32 %v186_v10, %v160_v14  ;;  %v224_v17 = vpop.f32.mrb[3].mxu0 }
 0x11f   :  { %166 = vst [vmem:[#allocation7] sm:$0xff] %v164_v15  ;;  %v165_v18 = vmax.f32 %v161_v16, 0.0 }
 0x121   :  { %167 = vst [vmem:[#allocation7 + $0x8] sm:$0xff] %v165_v18 }
 0x122   :  { %298 = shalt.err (!%p295_p6)
}
 0x123   :  { %s299_s15 = scalar_lea.hbm %s386_s3, 256 }
 0x124   :  { %p300_p7 = scmp.ne.s32.totalorder %s386_s3, %s299_s15  ;;  %p303_p8 = scmp.lt.u32.totalorder %s299_s15, %s386_s3 }
 0x126   :  { %p305_p9 = pnand %p303_p8, %p300_p7 }
 0x128   :  { %308 = shalt.err (!%p305_p9)
}
 0x129   :  { %s322_s20 = smov 128   ;;  %s323_s21 = smov 8  }
 0x12a   :  { %179 = dma.vmem_to_hbm [thread:$0]  %s174_s12, 256, %s386_s3, [#allocation4], %s322_s20, %s322_s20, %s323_s21  }
 0x12b   :  { %313 = dma.done.wait [#allocation4], 256  }
 0x12c   :  { %314 = vsyncadd [#allocation4], 4294967040 }
 0x12d   :  { %183 = vsyncpa [#allocation3], 1 }
 0x12e   :  { %184 = vsyncpa [#allocation6], 1 }
 0x12f   :  { %185 = vsyncpa [#allocation4], 1 }

</bundles_post_ra>
